<compile_context>
chip_gen: v7x
topology: tpu7x:2x2x1
jax: 0.10.0
libtpu: 0.0.40
codegen_flags: <defaults>
</compile_context>

<pallas_src>
import jax
import jax.numpy as jnp
from jax.experimental import pallas as pl
from jax.experimental.pallas import tpu as pltpu


def _mlp_kernel(x_ref, w1_ref, b1_ref, w2_ref, b2_ref, w3_ref, b3_ref, o_ref):
    # x_ref: (8, TB) — features on sublanes, batch on lanes.
    x = x_ref[...]

    # hidden1: (12, 8) @ (8, TB) -> (12, TB), + bias (12, 1), LeakyReLU(0.01)
    h1 = jnp.dot(w1_ref[...], x, preferred_element_type=jnp.float32) + b1_ref[...]
    h1 = jnp.where(h1 >= 0, h1, 0.01 * h1)

    # hidden2: (8, 12) @ (12, TB) -> (8, TB), + bias (8, 1), LeakyReLU(0.01)
    h2 = jnp.dot(w2_ref[...], h1, preferred_element_type=jnp.float32) + b2_ref[...]
    h2 = jnp.where(h2 >= 0, h2, 0.01 * h2)

    # output: Linear(8, 1) as a VPU broadcast-mul + feature reduction (no MXU),
    # then Sigmoid.  w3_ref is (8, 1); result z is (1, TB) — lane-dense store.
    z = jnp.sum(w3_ref[...] * h2, axis=0, keepdims=True) + b3_ref[...]
    o_ref[...] = jax.nn.sigmoid(z).astype(o_ref.dtype)


def classifier2_forward(x, params, tb=8192):
    """x: (B, 8) float32.  params: dict of torch-convention (out,in) weights/biases."""
    B = x.shape[0]

    # Batch tile: multiple of 128 (lane width), capped at `tb`, no bigger than
    # the (padded) batch itself.
    TB = min(tb, pl.cdiv(B, 128) * 128)
    B_pad = pl.cdiv(B, TB) * TB

    # Transposed, zero-padded activation layout: (8, B_pad), batch on lanes.
    x_pad = jnp.pad(x.astype(jnp.float32), ((0, B_pad - B), (0, 0)))
    xt = x_pad.T                                       # (8, B_pad)

    # Weights stay torch-style (out, in); biases become column vectors so the
    # in-kernel broadcast is across lanes.
    w1 = params["w1"].astype(jnp.float32)              # (12, 8)
    b1 = params["b1"].astype(jnp.float32).reshape(-1, 1)   # (12, 1)
    w2 = params["w2"].astype(jnp.float32)              # (8, 12)
    b2 = params["b2"].astype(jnp.float32).reshape(-1, 1)   # (8, 1)
    w3 = params["w3"].astype(jnp.float32).reshape(1, -1).T  # (8, 1)
    b3 = params["b3"].astype(jnp.float32).reshape(1, 1)     # (1, 1)

    resident = lambda a: pl.BlockSpec(a.shape, lambda i: tuple(0 for _ in a.shape))

    out_t = pl.pallas_call(
        _mlp_kernel,
        out_shape=jax.ShapeDtypeStruct((1, B_pad), jnp.float32),
        grid=(B_pad // TB,),
        in_specs=[
            pl.BlockSpec((8, TB), lambda i: (0, i)),   # x tile (streamed)
            resident(w1), resident(b1),                # weights/biases resident
            resident(w2), resident(b2),
            resident(w3), resident(b3),
        ],
        out_specs=pl.BlockSpec((1, TB), lambda i: (0, i)),
        compiler_params=pltpu.CompilerParams(
            dimension_semantics=("parallel",),
        ),
    )(xt, w1, b1, w2, b2, w3, b3)

    # Back to torch layout: (B, 1), dropping batch padding.
    return out_t[:, :B].T


def _init_params(key):
    """Deterministic init mimicking nn.Linear's U(-1/sqrt(fan_in), 1/sqrt(fan_in))."""
    ks = jax.random.split(key, 6)

    def lin(kw, kb, fan_in, fan_out):
        bound = 1.0 / jnp.sqrt(fan_in)
        w = jax.random.uniform(kw, (fan_out, fan_in), jnp.float32, -bound, bound)
        b = jax.random.uniform(kb, (fan_out,), jnp.float32, -bound, bound)
        return w, b

    w1, b1 = lin(ks[0], ks[1], 8, 12)
    w2, b2 = lin(ks[2], ks[3], 12, 8)
    w3, b3 = lin(ks[4], ks[5], 8, 1)
    return {"w1": w1, "b1": b1, "w2": w2, "b2": b2, "w3": w3, "b3": b3}


def _reference(x, p):
    """Plain-JAX reference matching the PyTorch forward."""
    h = x @ p["w1"].T + p["b1"]
    h = jnp.where(h >= 0, h, 0.01 * h)
    h = h @ p["w2"].T + p["b2"]
    h = jnp.where(h >= 0, h, 0.01 * h)
    z = h @ p["w3"].T + p["b3"]
    return jax.nn.sigmoid(z)


if __name__ == "__main__":
    key = jax.random.PRNGKey(0)
    kx, kp = jax.random.split(key)

    batch = 8
    x = jax.random.normal(kx, (batch, 8), jnp.float32)
    params = _init_params(kp)

    out = classifier2_forward(x, params)
    out = jax.block_until_ready(out)

    ref = _reference(x, params)
    assert out.shape == (batch, 1), out.shape
    assert jnp.allclose(out, ref, atol=1e-5, rtol=1e-5), (out, ref)

    # Also exercise a batch that is not a multiple of the tile (ragged tail path).
    x2 = jax.random.normal(kx, (300, 8), jnp.float32)
    out2 = jax.block_until_ready(classifier2_forward(x2, params, tb=128))
    assert out2.shape == (300, 1)
    assert jnp.allclose(out2, _reference(x2, params), atol=1e-5, rtol=1e-5)

    print("KERNEL_OK")
</pallas_src>

<mosaic_0001>
module attributes {stable_mosaic.version = 11 : i64} {
  func.func @_mlp_kernel(%arg0: i32, %arg1: memref<8x128xf32, #tpu.memory_space<vmem>>, %arg2: memref<12x8xf32, #tpu.memory_space<vmem>>, %arg3: memref<12x1xf32, #tpu.memory_space<vmem>>, %arg4: memref<8x12xf32, #tpu.memory_space<vmem>>, %arg5: memref<8x1xf32, #tpu.memory_space<vmem>>, %arg6: memref<8x1xf32, #tpu.memory_space<vmem>>, %arg7: memref<1x1xf32, #tpu.memory_space<vmem>>, %arg8: memref<1x128xf32, #tpu.memory_space<vmem>>) attributes {dimension_semantics = [#tpu.dimension_semantics<parallel>], iteration_bounds = array<i64: 1>, scalar_prefetch = 0 : i64, scratch_operands = 0 : i64, tpu.core_type = #tpu.core_type<tc>, window_params = [{transform_indices = @transform_0, window_bounds = array<i64: 8, 128>}, {pipeline_mode = #tpu.pipeline_mode<synchronous>, transform_indices = @transform_1, window_bounds = array<i64: 12, 8>}, {pipeline_mode = #tpu.pipeline_mode<synchronous>, transform_indices = @transform_2, window_bounds = array<i64: 12, 1>}, {pipeline_mode = #tpu.pipeline_mode<synchronous>, transform_indices = @transform_3, window_bounds = array<i64: 8, 12>}, {pipeline_mode = #tpu.pipeline_mode<synchronous>, transform_indices = @transform_4, window_bounds = array<i64: 8, 1>}, {pipeline_mode = #tpu.pipeline_mode<synchronous>, transform_indices = @transform_5, window_bounds = array<i64: 8, 1>}, {pipeline_mode = #tpu.pipeline_mode<synchronous>, transform_indices = @transform_6, window_bounds = array<i64: 1, 1>}, {transform_indices = @transform_7, window_bounds = array<i64: 1, 128>}]} {
    %c0 = arith.constant 0 : index
    %c0_0 = arith.constant 0 : index
    %0 = vector.load %arg1[%c0, %c0_0] : memref<8x128xf32, #tpu.memory_space<vmem>>, vector<8x128xf32>
    %c0_1 = arith.constant 0 : index
    %c0_2 = arith.constant 0 : index
    %1 = vector.load %arg2[%c0_1, %c0_2] : memref<12x8xf32, #tpu.memory_space<vmem>>, vector<12x8xf32>
    %cst = arith.constant dense<0.000000e+00> : vector<12x128xf32>
    %2 = tpu.matmul %1, %0, %cst {dimension_numbers = #tpu.dot_dimension_numbers<[1], [0], [0], [1], [0, 0, 1, 1], [], []>} : vector<12x8xf32>, vector<8x128xf32>, vector<12x128xf32> -> vector<12x128xf32>
    %c0_3 = arith.constant 0 : index
    %c0_4 = arith.constant 0 : index
    %3 = vector.load %arg3[%c0_3, %c0_4] : memref<12x1xf32, #tpu.memory_space<vmem>>, vector<12x1xf32>
    %4 = vector.broadcast %3 : vector<12x1xf32> to vector<12x128xf32>
    %5 = arith.addf %2, %4 : vector<12x128xf32>
    %cst_5 = arith.constant 0.000000e+00 : f32
    %6 = vector.broadcast %cst_5 : f32 to vector<12x128xf32>
    %7 = arith.cmpf oge, %5, %6 : vector<12x128xf32>
    %cst_6 = arith.constant 0.00999999977 : f32
    %8 = vector.broadcast %cst_6 : f32 to vector<12x128xf32>
    %9 = arith.mulf %8, %5 : vector<12x128xf32>
    %10 = arith.select %7, %5, %9 : vector<12x128xi1>, vector<12x128xf32>
    %c0_7 = arith.constant 0 : index
    %c0_8 = arith.constant 0 : index
    %11 = vector.load %arg4[%c0_7, %c0_8] : memref<8x12xf32, #tpu.memory_space<vmem>>, vector<8x12xf32>
    %cst_9 = arith.constant dense<0.000000e+00> : vector<8x128xf32>
    %12 = tpu.matmul %11, %10, %cst_9 {dimension_numbers = #tpu.dot_dimension_numbers<[1], [0], [0], [1], [0, 0, 1, 1], [], []>} : vector<8x12xf32>, vector<12x128xf32>, vector<8x128xf32> -> vector<8x128xf32>
    %c0_10 = arith.constant 0 : index
    %c0_11 = arith.constant 0 : index
    %13 = vector.load %arg5[%c0_10, %c0_11] : memref<8x1xf32, #tpu.memory_space<vmem>>, vector<8x1xf32>
    %14 = vector.broadcast %13 : vector<8x1xf32> to vector<8x128xf32>
    %15 = arith.addf %12, %14 : vector<8x128xf32>
    %cst_12 = arith.constant 0.000000e+00 : f32
    %16 = vector.broadcast %cst_12 : f32 to vector<8x128xf32>
    %17 = arith.cmpf oge, %15, %16 : vector<8x128xf32>
    %cst_13 = arith.constant 0.00999999977 : f32
    %18 = vector.broadcast %cst_13 : f32 to vector<8x128xf32>
    %19 = arith.mulf %18, %15 : vector<8x128xf32>
    %20 = arith.select %17, %15, %19 : vector<8x128xi1>, vector<8x128xf32>
    %c0_14 = arith.constant 0 : index
    %c0_15 = arith.constant 0 : index
    %21 = vector.load %arg6[%c0_14, %c0_15] : memref<8x1xf32, #tpu.memory_space<vmem>>, vector<8x1xf32>
    %22 = vector.broadcast %21 : vector<8x1xf32> to vector<8x128xf32>
    %23 = arith.mulf %22, %20 : vector<8x128xf32>
    %cst_16 = arith.constant dense<0.000000e+00> : vector<128xf32>
    %24 = vector.multi_reduction <add>, %23, %cst_16 [0] : vector<8x128xf32> to vector<128xf32>
    %25 = vector.shape_cast %24 : vector<128xf32> to vector<1x128xf32>
    %c0_17 = arith.constant 0 : index
    %c0_18 = arith.constant 0 : index
    %26 = vector.load %arg7[%c0_17, %c0_18] : memref<1x1xf32, #tpu.memory_space<vmem>>, vector<1x1xf32>
    %27 = vector.broadcast %26 : vector<1x1xf32> to vector<1x128xf32>
    %28 = arith.addf %25, %27 : vector<1x128xf32>
    %29 = arith.negf %28 : vector<1x128xf32>
    %30 = math.exp %29 : vector<1x128xf32>
    %cst_19 = arith.constant 1.000000e+00 : f32
    %31 = vector.broadcast %cst_19 : f32 to vector<1x128xf32>
    %32 = arith.addf %31, %30 : vector<1x128xf32>
    %33 = arith.divf %31, %32 : vector<1x128xf32>
    %c0_20 = arith.constant 0 : index
    %c0_21 = arith.constant 0 : index
    %34 = vector.load %arg8[%c0_20, %c0_21] : memref<1x128xf32, #tpu.memory_space<vmem>>, vector<1x128xf32>
    tpu.vector_store %arg8[%c0_20, %c0_21], %33 {strides = array<i32>} : memref<1x128xf32, #tpu.memory_space<vmem>>, vector<1x128xf32>,
    return
  }
  func.func @transform_0(%arg0: i32) -> (i32, i32) {
    %c0_i32 = arith.constant 0 : i32
    %c0_i32_0 = arith.constant 0 : i32
    return %c0_i32, %arg0 : i32, i32
  }
  func.func @transform_1(%arg0: i32) -> (i32, i32) {
    %c0_i32 = arith.constant 0 : i32
    %c0_i32_0 = arith.constant 0 : i32
    %c0_i32_1 = arith.constant 0 : i32
    return %c0_i32, %c0_i32_0 : i32, i32
  }
  func.func @transform_2(%arg0: i32) -> (i32, i32) {
    %c0_i32 = arith.constant 0 : i32
    %c0_i32_0 = arith.constant 0 : i32
    %c0_i32_1 = arith.constant 0 : i32
    return %c0_i32, %c0_i32_0 : i32, i32
  }
  func.func @transform_3(%arg0: i32) -> (i32, i32) {
    %c0_i32 = arith.constant 0 : i32
    %c0_i32_0 = arith.constant 0 : i32
    %c0_i32_1 = arith.constant 0 : i32
    return %c0_i32, %c0_i32_0 : i32, i32
  }
  func.func @transform_4(%arg0: i32) -> (i32, i32) {
    %c0_i32 = arith.constant 0 : i32
    %c0_i32_0 = arith.constant 0 : i32
    %c0_i32_1 = arith.constant 0 : i32
    return %c0_i32, %c0_i32_0 : i32, i32
  }
  func.func @transform_5(%arg0: i32) -> (i32, i32) {
    %c0_i32 = arith.constant 0 : i32
    %c0_i32_0 = arith.constant 0 : i32
    %c0_i32_1 = arith.constant 0 : i32
    return %c0_i32, %c0_i32_0 : i32, i32
  }
  func.func @transform_6(%arg0: i32) -> (i32, i32) {
    %c0_i32 = arith.constant 0 : i32
    %c0_i32_0 = arith.constant 0 : i32
    %c0_i32_1 = arith.constant 0 : i32
    return %c0_i32, %c0_i32_0 : i32, i32
  }
  func.func @transform_7(%arg0: i32) -> (i32, i32) {
    %c0_i32 = arith.constant 0 : i32
    %c0_i32_0 = arith.constant 0 : i32
    return %c0_i32, %arg0 : i32, i32
  }
}

</mosaic_0001>

<bundles_post_ra>
// kernel: tpu_custom_call.1
= control target key start
LH: loop header
LB: loop body
LE: loop exit
PB: predicated region body
PF: predicated region fallthrough
CT: control target
= control target key end

     0   :  { %s413_s0 = inlined_call_operand.vmem [shape: f32[8,128], index: 0, kind: input, shape index: {}]   ;;  %s414_s1 = inlined_call_operand.vmem [shape: f32[12,8], index: 1, kind: input, shape index: {}]   ;;  %s415_s2 = inlined_call_operand.vmem [shape: f32[12,1], index: 2, kind: input, shape index: {}]   ;;  %s416_s3 = inlined_call_operand.vmem [shape: f32[8,12], index: 3, kind: input, shape index: {}]   ;;  %s417_s4 = inlined_call_operand.vmem [shape: f32[8,1], index: 4, kind: input, shape index: {}]   ;;  %s418_s5 = inlined_call_operand.vmem [shape: f32[8,1], index: 5, kind: input, shape index: {}]   ;;  %s419_s6 = inlined_call_operand.<no memory space> [shape: f32[1,1], index: 6, kind: input, shape index: {}]   ;;  %s420_s7 = inlined_call_operand.hbm [shape: f32[1,128], index: 7, kind: output, shape index: {}]  }
   0x1   :  { %v12_v0 = vstv %s419_s6 }
   0x2   :  { %13 = vst [vmem:[#allocation2] sm:$0x1] %v12_v0 }
   0x3   :  { %v29_v1 = vld [vmem:[%s413_s0] sm:$0xff]  ;;  %vm44_vm0 = vcmask 64512   ;;  %v31_v3 = vld [vmem:[%s414_s1 + $0x8] sm:$0xf]  ;;  %v328_v5 = vmov 0  }
   0x4   :  { %v30_v2 = vld [vmem:[%s414_s1] sm:$0xff]  ;;  %276 = vmatprep.subr.mxu0 %v29_v1  ;;  %298 = vset.pattern.permute.xlu0 %v328_v5 }
   0x5   :  { %278 = vmatprep.mubr.msk.f32.mxu0 %vm44_vm0, %v30_v2  ;;  %v32_v4 = vld [vmem:[%s415_s2] sm:$0xff]  ;;  %277 = vmatpush3.msra.mxu0 %v29_v1 }
   0x6   :  { %14 = vsyncpa [#allocation4], 0  ;;  %279 = vmatmul.mubr.msk.f32.vlgmr.msra.gmra.mrb[0].mxu0 %vm44_vm0, %v31_v3  ;;  %36 = vperm.xlu0 %298, %v32_v4   ;;  %v33_v6 = vld [vmem:[%s415_s2 + $0x8] sm:$0xf]  ;;  %v329_v8 = vmov 0.0|0.0   ;;  %vm330_vm1 = vmmov 0   ;;  %v239_v31 = vlaneseq }
   0x7   :  { %299 = vset.pattern.permute.xlu1 %v328_v5  ;;  %288 = vmatprep.subr.bf16.mxu1 %v329_v8  ;;  %v331_v9 = vmov 0.0   ;;  %v133_v10 = vld [vmem:[%s417_s4] sm:$0xff]  ;;  %vm143_vm3 = vcmask 1043456   ;;  %vm332_vm5 = vmmov 1   ;;  %vm139_vm7 = vcmask 97280  }
   0x8   :  { %285 = vmatprep.mubr.msk.f32.mxu1 %vm330_vm1, %v331_v9  ;;  %136 = vperm.xlu1 %299, %v133_v10   ;;  %v220_v11 = vld [vmem:[%s418_s5] sm:$0xff]  ;;  %vm290_vm6 = vmpackc.low %vm143_vm3, %vm332_vm5  ;;  %v240_v34 = vshrl.u32 %v239_v31, 7 }
   0x9   :  { %v233_v7 = vld [vmem:[#allocation2] sm:$0x1] }
   0xa   :  { %41 = vperm.xlu0 %298, %v33_v6   ;;  %v132_v23 = vld [vmem:[%s416_s3] sm:$0xff]  ;;  %v241_v37 = vsub.s32 0, %v240_v34  ;;  %s333_s3 = smov [#allocation3]  }
   0xb   :  { %s257_s5 = sshll.u32 %s333_s3, 4  ;;  %s258_s5 = int_to_ptr.vmem [resolvable:$true] %s257_s5 }
   0xc   :  { %223 = vperm.xlu1 %299, %v220_v11   ;;  %s304_s14 = scalar_lea.vmem %s258_s5, 16  ;;  %s308_s15 = scalar_lea.vmem %s258_s5, 32 }
   0xd   :  { %p305_p0 = scmp.ne.s32.totalorder %s258_s5, %s304_s14  ;;  %p309_p1 = scmp.lt.s32.totalorder %s258_s5, %s258_s5 }
   0xe   :  { %236 = vperm.xlu0 %298, %v233_v7   ;;  %p310_p2 = scmp.lt.s32.totalorder %s308_s15, %s304_s14 }
  0x10   :  { %p311_p3 = por %p310_p2, %p309_p1 }
  0x12   :  { %p312_p4 = pnand %p311_p3, %p305_p0 }
  0x85   :  { %v37_v12 = vpop.permute.xlu0 %36 }
  0x87   :  { %v137_v24 = vpop.permute.xlu1 %136 }
  0x89   :  { %v42_v13 = vpop.permute.xlu0 %41 }
  0x8b   :  { %v224_v29 = vpop.permute.xlu1 %223 }
  0x8d   :  { %v237_v39 = vpop.permute.xlu0 %236 }
  0x8e   :  { %v242_v41 = vrot.slane %v237_v39, %v241_v37 }
  0xd9   :  { %v280_v14 = vpop.f32.mrb[0].mxu0 }
  0xda   :  { %v123_v15 = vadd.f32 %v280_v14, %v42_v13  ;;  %v117_v16 = vpop.f32.mrb[1].mxu0 }
  0xdb   :  { %v118_v17 = vadd.f32 %v117_v16, %v37_v12 }
  0xdc   :  { %vm127_vm2 = vcmp.ge.f32.partialorder %v123_v15, 0.0  ;;  %v129_v18 = vmul.f32 0.01, %v123_v15 }
  0xdd   :  { %vm126_vm4 = vcmp.ge.f32.partialorder %v118_v17, 0.0  ;;  %v128_v19 = vmul.f32 0.01, %v118_v17 }
  0xde   :  { %v131_v20 = vsel %vm127_vm2, %v123_v15, %v129_v18 }
  0xdf   :  { %v130_v21 = vsel %vm126_vm4, %v118_v17, %v128_v19 }
  0xe0   :  { %v289_v22 = vpack.c.bf16 %v131_v20, %v130_v21 }
  0xe2   :  { %291 = vmatpush3.bf16.msk.msra.mxu1 %vm290_vm6, %v289_v22 }
  0xe5   :  { %286 = vmatmul.mubr.msk.f32.vlgmr.msra.gmra.mrb[0].mxu1 %vm139_vm7, %v132_v23 }
 0x1b8   :  { %v213_v25 = vpop.f32.mrb[0].mxu1 }
 0x1b9   :  { %v214_v26 = vadd.f32 %v213_v25, %v137_v24  ;;  %v287_v27 = vpop.f32.mrb[1].mxu1 }
 0x1bb   :  { %vm217_vm8 = vcmp.ge.f32.partialorder %v214_v26, 0.0  ;;  %v218_v28 = vmul.f32 0.01, %v214_v26 }
 0x1bd   :  { %v219_v30 = vsel %vm217_vm8, %v214_v26, %v218_v28 }
 0x1be   :  { %v226_v32 = vmul.f32 %v224_v29, %v219_v30 }
 0x1c0   :  { %v227_v33 = vrot.slane %v226_v32, 4 }
 0x1c2   :  { %v228_v35 = vadd.f32 %v227_v33, %v226_v32 }
 0x1c4   :  { %v229_v36 = vrot.slane %v228_v35, 2 }
 0x1c6   :  { %v230_v38 = vadd.f32 %v229_v36, %v228_v35 }
 0x1c8   :  { %v231_v40 = vrot.slane %v230_v38, 1 }
 0x1ca   :  { %v232_v42 = vadd.f32 %v231_v40, %v230_v38 }
 0x1cc   :  { %v243_v43 = vadd.f32 %v242_v41, %v232_v42 }
 0x1ce   :  { %v269_v44 = vmul.f32 -1.442695, %v243_v43 }
 0x1d0   :  { %300 = vpow2.f32 %v269_v44 }
 0x1da   :  { %v301_v45 = vpop.eup %300 }
 0x1db   :  { %v247_v46 = vadd.f32 1.0, %v301_v45 }
 0x1dd   :  { %302 = vrcp.f32 %v247_v46 }
 0x1e7   :  { %v303_v47 = vpop.eup %302 }
 0x1e8   :  { %250 = vst [vmem:[#allocation3] sm:$0x1] %v303_v47 }
 0x1e9   :  { %315 = shalt.err (!%p312_p4)
}
 0x1ea   :  { %s316_s18 = scalar_lea.hbm %s420_s7, 16 }
 0x1eb   :  { %p317_p5 = scmp.ne.s32.totalorder %s420_s7, %s316_s18  ;;  %p320_p6 = scmp.lt.u32.totalorder %s316_s18, %s420_s7 }
 0x1ed   :  { %p322_p7 = pnand %p320_p6, %p317_p5 }
 0x1ef   :  { %325 = shalt.err (!%p322_p7)
}
 0x1f0   :  { %260 = dma.vmem_to_hbm [thread:$0]  %s258_s5, 16, %s420_s7, [#allocation4]  }
 0x1f1   :  { %326 = dma.done.wait [#allocation4], 16  }
 0x1f2   :  { %327 = vsyncadd [#allocation4], 4294967280 }
 0x1f3   :  { %264 = vsyncpa [#allocation4], 1 }

</bundles_post_ra>
